<compile_context>
chip_gen: v5e
topology: v5e:2x2
jax: 0.10.0
libtpu: 0.0.40
codegen_flags: <defaults>
</compile_context>

<pallas_src>
import jax
import jax.numpy as jnp
from jax.experimental import pallas as pl
from jax.experimental.pallas import tpu as pltpu


# ----------------------------------------------------------------------------
# Kernel: channels on sublanes, pixels on lanes.
#   x tile      : (C, T)     T = TILE_HW pixels (lane-dense)
#   w_fused[b]  : (2C, C)    rows [0,C)  = gate-folded concat weight (channel path)
#                            rows [C,2C) = CoordConv 1x1 weight (x part)
#   cbias tile  : (C, T)     W_coord @ coords + b_spatial (batch invariant)
#   wc_sp       : (C, C)     concat weight, spatial half
#   bc          : (C, 1)     concat bias
# ----------------------------------------------------------------------------
def attention_kernel(x_ref, wfused_ref, cbias_ref, wcsp_ref, bc_ref, o_ref):
    x = x_ref[0]                                              # (C, T)
    c = x.shape[0]
    # Single MXU pass over x feeds both branches.
    fused = jnp.dot(wfused_ref[0], x,
                    preferred_element_type=jnp.float32)       # (2C, T)
    ch_part = fused[:c]                                       # gate-folded channel branch
    spatial = jnp.maximum(fused[c:] + cbias_ref[...], 0.0)    # ReLU(CoordConv 1x1)
    out = (ch_part
           + jnp.dot(wcsp_ref[...], spatial, preferred_element_type=jnp.float32)
           + bc_ref[...])
    o_ref[0] = out


def make_coords(H, W):
    # AddCoords(rank=2, with_r=True), PyTorch semantics.
    # Guard H==1 / W==1 (PyTorch itself would produce inf/NaN there).
    hd = max(H - 1, 1)
    wd = max(W - 1, 1)
    xx = jnp.broadcast_to((jnp.arange(H, dtype=jnp.float32) / hd)[:, None], (H, W))
    yy = jnp.broadcast_to((jnp.arange(W, dtype=jnp.float32) / wd)[None, :], (H, W))
    xx = xx * 2.0 - 1.0
    yy = yy * 2.0 - 1.0
    rr = jnp.sqrt((xx - 0.5) ** 2 + (yy - 0.5) ** 2)
    return xx, yy, rr


def _pick_tile_hw(HW, C, bytes_per_elem=4, vmem_budget=8 << 20):
    """Largest pixel tile that is a multiple of 128, divides HW, and keeps the
    per-step (x, out, cbias) double-buffered footprint within a VMEM budget."""
    if HW % 128 != 0:
        return HW                      # full-extent block (valid per BlockSpec rules)
    max_rows = max(128, vmem_budget // (6 * max(C, 1) * bytes_per_elem))
    tile, t = 128, 128
    while t <= HW and t <= max_rows:
        if HW % t == 0:
            tile = t
        t += 128
    return tile


def attention_forward(x_nchw, params):
    N, C, H, W = x_nchw.shape
    HW = H * W
    x = x_nchw.reshape(N, C, HW).astype(jnp.float32)          # no transpose needed

    # ---- ChannelAttention gate, hoisted to the wrapper (tiny: (N, C)) ----
    p = jnp.mean(x, axis=2)                                   # AdaptiveAvgPool2d(1)
    w1d = params["w1d"].astype(jnp.float32)
    ppad = jnp.pad(p, ((0, 0), (1, 1)))                       # Conv1d(1,1,3,pad=1) as 3-tap
    y = w1d[0] * ppad[:, :-2] + w1d[1] * ppad[:, 1:-1] + w1d[2] * ppad[:, 2:]
    gate = jax.nn.sigmoid(y)                                  # (N, C)

    # ---- fold gate into the concat conv's channel-half weight (per batch) ----
    wc = params["w_concat"].astype(jnp.float32)               # (C, 2C)  [out, in]
    wc_ch = wc[:, :C]
    wc_sp = wc[:, C:]
    w_eff = wc_ch[None, :, :] * gate[:, None, :]              # (N, C, C)

    wsp = params["w_spatial"].astype(jnp.float32)             # (C, C+3) [out, in]
    wsp_x = wsp[:, :C]
    wsp_c = wsp[:, C:]
    w_fused = jnp.concatenate(
        [w_eff, jnp.broadcast_to(wsp_x[None], (N, C, C))], axis=1)   # (N, 2C, C)

    # ---- CoordConv coordinate contribution as a batch-invariant bias ----
    xx, yy, rr = make_coords(H, W)
    coords = jnp.stack([xx.reshape(HW), yy.reshape(HW), rr.reshape(HW)], 0)  # (3, HW)
    cbias = wsp_c @ coords + params["b_spatial"].astype(jnp.float32)[:, None]  # (C, HW)

    bc = params["b_concat"].astype(jnp.float32).reshape(C, 1)

    tile = _pick_tile_hw(HW, C)
    num_tiles = HW // tile

    flops = 6 * N * HW * C * C
    bytes_accessed = 4 * (2 * N * C * HW + C * HW + N * 2 * C * C + C * C + C)

    out = pl.pallas_call(
        attention_kernel,
        out_shape=jax.ShapeDtypeStruct((N, C, HW), jnp.float32),
        grid_spec=pltpu.PrefetchScalarGridSpec(
            num_scalar_prefetch=0,
            # pixel tile is the slow axis -> cbias re-DMAs once per tile,
            # not once per (tile, batch) step
            grid=(num_tiles, N),
            in_specs=[
                pl.BlockSpec((1, C, tile), lambda t, b: (b, 0, t)),    # x
                pl.BlockSpec((1, 2 * C, C), lambda t, b: (b, 0, 0)),   # fused W (per batch)
                pl.BlockSpec((C, tile), lambda t, b: (0, t)),          # coord bias
                pl.BlockSpec((C, C), lambda t, b: (0, 0)),             # concat W (spatial)
                pl.BlockSpec((C, 1), lambda t, b: (0, 0)),             # concat bias
            ],
            out_specs=pl.BlockSpec((1, C, tile), lambda t, b: (b, 0, t)),
        ),
        compiler_params=pltpu.CompilerParams(
            dimension_semantics=("parallel", "parallel")),
        cost_estimate=pl.CostEstimate(
            flops=flops, transcendentals=0, bytes_accessed=bytes_accessed),
    )(x, w_fused, cbias, wc_sp, bc)

    return out.reshape(N, C, H, W)


def attention_reference(x, params):
    """Pure-JAX reference mirroring the PyTorch forward (NCHW)."""
    N, C, H, W = x.shape
    # ChannelAttention
    p = jnp.mean(x, axis=(2, 3))                                   # (N, C)
    w = params["w1d"]
    ppad = jnp.pad(p, ((0, 0), (1, 1)))
    y = w[0] * ppad[:, :-2] + w[1] * ppad[:, 1:-1] + w[2] * ppad[:, 2:]
    gate = jax.nn.sigmoid(y)[:, :, None, None]
    channel = x * gate
    # CoordConv2d
    xx, yy, rr = make_coords(H, W)
    coords = jnp.broadcast_to(jnp.stack([xx, yy, rr], axis=0)[None], (N, 3, H, W))
    xin = jnp.concatenate([x, coords], axis=1)                     # (N, C+3, H, W)
    sp = jnp.einsum('oc,nchw->nohw', params["w_spatial"], xin) \
        + params["b_spatial"][None, :, None, None]
    spatial = jnp.maximum(sp, 0.0)
    # concat 1x1 conv
    cat = jnp.concatenate([channel, spatial], axis=1)              # (N, 2C, H, W)
    out = jnp.einsum('oc,nchw->nohw', params["w_concat"], cat) \
        + params["b_concat"][None, :, None, None]
    return out


def init_params(key, C):
    ks = jax.random.split(key, 5)
    def u(k, shape, fan_in):
        bound = 1.0 / jnp.sqrt(fan_in)
        return jax.random.uniform(k, shape, jnp.float32, -bound, bound)
    return {
        "w1d": u(ks[0], (3,), 3.0),                 # Conv1d(1,1,3,bias=False) weight
        "w_spatial": u(ks[1], (C, C + 3), C + 3.0), # CoordConv 1x1 weight (Cout, Cin)
        "b_spatial": u(ks[2], (C,), C + 3.0),
        "w_concat": u(ks[3], (C, 2 * C), 2.0 * C),  # concat 1x1 weight
        "b_concat": u(ks[4], (C,), 2.0 * C),
    }


if __name__ == "__main__":
    key = jax.random.PRNGKey(0)
    k_x, k_p = jax.random.split(key)
    N, C, H, W = 2, 4, 16, 16
    x = jax.random.normal(k_x, (N, C, H, W), jnp.float32)
    params = init_params(k_p, C)

    out = attention_forward(x, params)
    out = jax.block_until_ready(out)

    ref = attention_reference(x, params)
    assert out.shape == (N, C, H, W)
    assert jnp.allclose(out, ref, atol=1e-4, rtol=1e-4), \
        f"max abs err {jnp.max(jnp.abs(out - ref))}"
    print("KERNEL_OK")
</pallas_src>

<mosaic_0001>
module attributes {stable_mosaic.version = 11 : i64} {
  func.func @attention_kernel(%arg0: i32, %arg1: i32, %arg2: memref<1x4x256xf32, #tpu.memory_space<vmem>>, %arg3: memref<1x8x4xf32, #tpu.memory_space<vmem>>, %arg4: memref<4x256xf32, #tpu.memory_space<vmem>>, %arg5: memref<4x4xf32, #tpu.memory_space<vmem>>, %arg6: memref<4x1xf32, #tpu.memory_space<vmem>>, %arg7: memref<1x4x256xf32, #tpu.memory_space<vmem>>) attributes {dimension_semantics = [#tpu.dimension_semantics<parallel>, #tpu.dimension_semantics<parallel>], iteration_bounds = array<i64: 1, 2>, scalar_prefetch = 0 : i64, scratch_operands = 0 : i64, tpu.core_type = #tpu.core_type<tc>, window_params = [{transform_indices = @transform_0, window_bounds = array<i64: 1, 4, 256>}, {transform_indices = @transform_1, window_bounds = array<i64: 1, 8, 4>}, {transform_indices = @transform_2, window_bounds = array<i64: 4, 256>}, {pipeline_mode = #tpu.pipeline_mode<synchronous>, transform_indices = @transform_3, window_bounds = array<i64: 4, 4>}, {pipeline_mode = #tpu.pipeline_mode<synchronous>, transform_indices = @transform_4, window_bounds = array<i64: 4, 1>}, {transform_indices = @transform_5, window_bounds = array<i64: 1, 4, 256>}]} {
    %c0 = arith.constant 0 : index
    %c0_0 = arith.constant 0 : index
    %c0_1 = arith.constant 0 : index
    %0 = vector.load %arg2[%c0, %c0_0, %c0_1] : memref<1x4x256xf32, #tpu.memory_space<vmem>>, vector<1x4x256xf32>
    %1 = vector.shape_cast %0 : vector<1x4x256xf32> to vector<4x256xf32>
    %c0_2 = arith.constant 0 : index
    %c0_3 = arith.constant 0 : index
    %c0_4 = arith.constant 0 : index
    %2 = vector.load %arg3[%c0_2, %c0_3, %c0_4] : memref<1x8x4xf32, #tpu.memory_space<vmem>>, vector<1x8x4xf32>
    %3 = vector.shape_cast %2 : vector<1x8x4xf32> to vector<8x4xf32>
    %cst = arith.constant dense<0.000000e+00> : vector<8x256xf32>
    %4 = tpu.matmul %3, %1, %cst {dimension_numbers = #tpu.dot_dimension_numbers<[1], [0], [0], [1], [0, 0, 1, 1], [], []>} : vector<8x4xf32>, vector<4x256xf32>, vector<8x256xf32> -> vector<8x256xf32>
    %5 = vector.extract_strided_slice %4 {offsets = [0, 0], sizes = [4, 256], strides = [1, 1]} : vector<8x256xf32> to vector<4x256xf32>
    %6 = vector.extract_strided_slice %4 {offsets = [4, 0], sizes = [4, 256], strides = [1, 1]} : vector<8x256xf32> to vector<4x256xf32>
    %c0_5 = arith.constant 0 : index
    %c0_6 = arith.constant 0 : index
    %7 = vector.load %arg4[%c0_5, %c0_6] : memref<4x256xf32, #tpu.memory_space<vmem>>, vector<4x256xf32>
    %8 = arith.addf %6, %7 : vector<4x256xf32>
    %cst_7 = arith.constant 0.000000e+00 : f32
    %9 = vector.broadcast %cst_7 : f32 to vector<4x256xf32>
    %10 = arith.maximumf %8, %9 : vector<4x256xf32>
    %c0_8 = arith.constant 0 : index
    %c0_9 = arith.constant 0 : index
    %11 = vector.load %arg5[%c0_8, %c0_9] : memref<4x4xf32, #tpu.memory_space<vmem>>, vector<4x4xf32>
    %cst_10 = arith.constant dense<0.000000e+00> : vector<4x256xf32>
    %12 = tpu.matmul %11, %10, %cst_10 {dimension_numbers = #tpu.dot_dimension_numbers<[1], [0], [0], [1], [0, 0, 1, 1], [], []>} : vector<4x4xf32>, vector<4x256xf32>, vector<4x256xf32> -> vector<4x256xf32>
    %13 = arith.addf %5, %12 : vector<4x256xf32>
    %c0_11 = arith.constant 0 : index
    %c0_12 = arith.constant 0 : index
    %14 = vector.load %arg6[%c0_11, %c0_12] : memref<4x1xf32, #tpu.memory_space<vmem>>, vector<4x1xf32>
    %15 = vector.broadcast %14 : vector<4x1xf32> to vector<4x256xf32>
    %16 = arith.addf %13, %15 : vector<4x256xf32>
    %c0_13 = arith.constant 0 : index
    %c0_14 = arith.constant 0 : index
    %c0_15 = arith.constant 0 : index
    %17 = vector.load %arg7[%c0_13, %c0_14, %c0_15] : memref<1x4x256xf32, #tpu.memory_space<vmem>>, vector<1x4x256xf32>
    %18 = vector.shape_cast %17 : vector<1x4x256xf32> to vector<4x256xf32>
    %19 = vector.shape_cast %16 : vector<4x256xf32> to vector<1x4x256xf32>
    tpu.vector_store %arg7[%c0_13, %c0_14, %c0_15], %19 {strides = array<i32>} : memref<1x4x256xf32, #tpu.memory_space<vmem>>, vector<1x4x256xf32>,
    return
  }
  func.func @transform_0(%arg0: i32, %arg1: i32) -> (i32, i32, i32) {
    %c0_i32 = arith.constant 0 : i32
    %c0_i32_0 = arith.constant 0 : i32
    return %arg1, %c0_i32, %arg0 : i32, i32, i32
  }
  func.func @transform_1(%arg0: i32, %arg1: i32) -> (i32, i32, i32) {
    %c0_i32 = arith.constant 0 : i32
    %c0_i32_0 = arith.constant 0 : i32
    %c0_i32_1 = arith.constant 0 : i32
    return %arg1, %c0_i32, %c0_i32_0 : i32, i32, i32
  }
  func.func @transform_2(%arg0: i32, %arg1: i32) -> (i32, i32) {
    %c0_i32 = arith.constant 0 : i32
    %c0_i32_0 = arith.constant 0 : i32
    return %c0_i32, %arg0 : i32, i32
  }
  func.func @transform_3(%arg0: i32, %arg1: i32) -> (i32, i32) {
    %c0_i32 = arith.constant 0 : i32
    %c0_i32_0 = arith.constant 0 : i32
    %c0_i32_1 = arith.constant 0 : i32
    return %c0_i32, %c0_i32_0 : i32, i32
  }
  func.func @transform_4(%arg0: i32, %arg1: i32) -> (i32, i32) {
    %c0_i32 = arith.constant 0 : i32
    %c0_i32_0 = arith.constant 0 : i32
    %c0_i32_1 = arith.constant 0 : i32
    return %c0_i32, %c0_i32_0 : i32, i32
  }
  func.func @transform_5(%arg0: i32, %arg1: i32) -> (i32, i32, i32) {
    %c0_i32 = arith.constant 0 : i32
    %c0_i32_0 = arith.constant 0 : i32
    return %arg1, %c0_i32, %arg0 : i32, i32, i32
  }
}

</mosaic_0001>

<bundles_post_ra>
// kernel: tpu_custom_call.1
= control target key start
LH: loop header
LB: loop body
LE: loop exit
PB: predicated region body
PF: predicated region fallthrough
CT: control target
= control target key end

     0   :  { %10 = vsyncpa [#allocation3], 0  ;;  %s861_s0 = inlined_call_operand.vmem [shape: f32[2,4,256], index: 0, kind: input, shape index: {}]   ;;  %s862_s1 = inlined_call_operand.vmem [shape: f32[2,8,4], index: 1, kind: input, shape index: {}]   ;;  %s863_s2 = inlined_call_operand.vmem [shape: f32[4,256], index: 2, kind: input, shape index: {}]   ;;  %s864_s3 = inlined_call_operand.vmem [shape: f32[4,4], index: 3, kind: input, shape index: {}]   ;;  %s865_s4 = inlined_call_operand.vmem [shape: f32[4,1], index: 4, kind: input, shape index: {}]   ;;  %s866_s5 = inlined_call_operand.hbm [shape: f32[2,4,256], index: 5, kind: output, shape index: {}]  }
   0x1   :  { %12 = vsyncpa [#allocation3 + $0x1], 0  ;;  %s743_s18 = smov 0   ;;  %s745_s19 = smov 0  }
   0x2   :  { %s747_s20 = smov 0   ;;  %s749_s21 = smov 0  }
   0x3   :  { %s751_s22 = smov 0   ;;  %s753_s23 = smov 0  }
   0x4 LB: > { %s550_s24 = sadd.s32 4294967295, %s710_s23   ;;  %s551_s25 = sadd.s32 4294967294, %s710_s23   ;;  %s710_s23 = sphi %s753_s23, %s18_s23   ;;  %s706_s22 = sphi %s751_s22, %s873_s22   ;;  %s702_s21 = sphi %s749_s21, %s872_s21   ;;  %s698_s20 = sphi %s747_s20, %s871_s20   ;;  %s694_s19 = sphi %s745_s19, %s870_s19   ;;  %s690_s18 = sphi %s743_s18, %s869_s18  }
   0x5   : > { %s27_s26 = sadd.s32 1, %s706_s22  ;;  %s161_s27 = sadd.s32 1, %s698_s20 }
   0x6   : > { %p28_p0 = scmp.ge.s32.totalorder %s27_s26, 2  ;;  %p171_p1 = scmp.ne.s32.totalorder %s698_s20, %s694_s19 }
   0x7   : > { %p172_p2 = scmp.eq.s32.totalorder %s550_s24, 1  ;;  %p177_p3 = scmp.ne.s32.totalorder %s694_s19, %s690_s18 }
   0x8   : > { %s875_s26 = smov (%p28_p0, %s27_s26), 0  ;;  %p178_p5 = scmp.eq.s32.totalorder %s551_s25, 1 }
   0x9   : > { %p783_p4 = por %p172_p2, %p171_p1  ;;  %s156_s29 = ssub.s32 %s706_s22, %s875_s26 }
   0xa   : > { %p555_p6 = scmp.ge.s32.totalorder %s710_s23, 1  ;;  %p159_p7 = scmp.eq.s32.totalorder %s156_s29, 0 }
   0xb   : > { %p790_p8 = por %p178_p5, %p177_p3  ;;  %p231_p9 = scmp.lt.s32.totalorder %s710_s23, 3 }
   0xc   : > { %s796_s6 = scalar_select %p159_p7, %s698_s20, %s161_s27  }
   0xd   : > { %p232_p10 = pnand %p555_p6, %p231_p9 }
   0xe   : > { %p273_p11 = scmp.lt.s32.totalorder (!%p232_p10), %s702_s21, 1  ;;  %s269_s29 = sand.u32 (!%p232_p10), 1, %s694_s19  }
   0xf   : > { %235 = sbr.rel (%p232_p10) target bundleno = 309 (0x135), region = 40  ;;  %s652_s25 = scalar_lea.hbm (!%p232_p10), %s866_s5, 16 }
  0x14   : > { %s274_s7 = scalar_select %p273_p11, %s702_s21, 1  ;;  %vm303_vm0 = vcmask 1043456   ;;  %v348_v1 = vld [vmem:[%s863_s2] sm:$0xff]  ;;  %vm299_vm1 = vcmask 31744   ;;  %v712_v6 = vmov 0  }
  0x15   : > { %v414_v5 = vld [vmem:[%s865_s4] sm:$0xf]  ;;  %631 = vset.pattern.permute.xlu0 %v712_v6 }
  0x16   : > { %s573_s8 = sshll.u32 %s274_s7, 3  ;;  %417 = vperm.xlu0 %631, %v414_v5   ;;  %v360_v17 = vld [vmem:[%s864_s3] sm:$0xf]  ;;  %s556_s7 = sshll.u32 %s269_s29, 3 }
  0x17   : > { %s280_s11 = scalar_lea.vmem %s861_s0, %s573_s8  ;;  %s285_s14 = scalar_lea.vmem %s862_s1, %s573_s8 }
  0x18   : > { %v293_v0 = vld [vmem:[%s280_s11] sm:$0xff]  ;;  %s574_s8 = sshll.u32 %s702_s21, 3  ;;  %s271_s12 = scalar_lea.vmem [#allocation2], %s556_s7 }
  0x19   : > { %296 = vst [vmem:[#allocation1] ss:$2 sm:$0xff] %v293_v0  ;;  %v294_v2 = vld [vmem:[%s285_s14] sm:$0xff]  ;;  %s442_s11 = scalar_lea.hbm %s866_s5, %s574_s8  ;;  %s444_s13 = sshll.u32 %s271_s12, 4  ;;  %s445_s13 = int_to_ptr.vmem [resolvable:$true] %s444_s13 }
  0x1a   : > { %s446_s14 = sshll.u32 %s442_s11, 4  ;;  %s429_s21 = scalar_lea.sflag [#allocation3], %s269_s29  ;;  %s447_s14 = int_to_ptr.hbm [resolvable:$true] %s446_s14 }
  0x1b   : > { %s646_s15 = sshra.s32 %s447_s14, 4  ;;  %s647_s15 = int_to_ptr.hbm [resolvable:$true] %s646_s15 }
  0x1c   : > { %s648_s16 = scalar_lea.hbm %s647_s15, 8  ;;  %p653_p1 = scmp.lt.s32.totalorder %s647_s15, %s866_s5 }
  0x1d   : > { %p649_p12 = scmp.ne.s32.totalorder %s647_s15, %s648_s16  ;;  %p654_p2 = scmp.lt.s32.totalorder %s652_s25, %s648_s16 }
  0x1f   : > { %p650_p13 = pnand %p649_p12, %p783_p4  ;;  %p655_p3 = por %p654_p2, %p653_p1 }
  0x20   : > { %v297_v3 = vld.sshfl [vmem:[#allocation1] sm:$0xff pattern:$0x75316420]  ;;  %v298_v4 = vld.sshfl [vmem:[#allocation1 + $0x8] sm:$0xff pattern:$0x75316420] }
  0x21   : > { %560 = vmatpush.msk.msra.mxu0 %vm303_vm0, %v297_v3  ;;  %562 = vmatpush.msk.msra.mxu1 %vm303_vm0, %v298_v4  ;;  %351 = vst [vmem:[#allocation1 + $0x1] ss:$2 sm:$0xff] %v348_v1  ;;  %p651_p0 = pneg %p650_p13 }
  0x22   : > { %561 = vmatmul.msk.f32.vlgmr.msra.gmra.mxu0 %vm299_vm1, %v294_v2  ;;  %563 = vmatmul.msk.f32.vlgmr.msra.gmra.mxu1 %vm299_vm1, %v294_v2 }
  0x23   : > { %p656_p5 = pnand %p655_p3, %p651_p0 }
  0x28   : > { %v352_v7 = vld.sshfl [vmem:[#allocation1] sm:$0xff pattern:$0x75316420]  ;;  %v353_v8 = vld.sshfl [vmem:[#allocation1 + $0x8] sm:$0xff pattern:$0x75316420] }
  0x88   : > { %v418_v18 = vpop.permute.xlu0 %417 }
  0x9f   : > { %v325_v9 = vpop.f32.mrf.mxu0  ;;  %v345_v10 = vpop.f32.mrf.mxu1 }
  0xa0   : > { %v356_v11 = vadd.f32 %v352_v7, %v325_v9  ;;  %v357_v12 = vadd.f32 %v353_v8, %v345_v10 }
  0xa2   : > { %v358_v13 = vmax.f32 %v356_v11, 0.0  ;;  %v359_v14 = vmax.f32 %v357_v12, 0.0 }
  0xa4   : > { %v363_v15 = vrot.slane %v358_v13, 4  ;;  %v364_v16 = vrot.slane %v359_v14, 4 }
  0xa6   : > { %564 = vmatpush.msk.msra.mxu2 %vm303_vm0, %v363_v15  ;;  %566 = vmatpush.msk.msra.mxu3 %vm303_vm0, %v364_v16 }
  0xa7   : > { %565 = vmatmul.msk.f32.vlgmr.msra.gmra.mxu2 %vm299_vm1, %v360_v17  ;;  %567 = vmatmul.msk.f32.vlgmr.msra.gmra.mxu3 %vm299_vm1, %v360_v17 }
 0x12a   : > { %v389_v19 = vpop.f32.mrf.mxu2  ;;  %v409_v20 = vpop.f32.mrf.mxu3 }
 0x12b   : > { %v412_v21 = vadd.f32 %v389_v19, %v325_v9  ;;  %v413_v22 = vadd.f32 %v409_v20, %v345_v10 }
 0x12d   : > { %v421_v23 = vadd.f32 %v418_v18, %v413_v22  ;;  %v420_v24 = vadd.f32 %v418_v18, %v412_v21 }
 0x12f   : > { %v424_v25 = vrot.slane %v421_v23, 4 }
 0x131   : > { %v425_v26 = vsel %vm303_vm0, %v420_v24, %v424_v25 }
 0x132   : > { %427 = vst [vmem:[%s271_s12] sm:$0xff] %v425_v26 }
 0x133   : > { %659 = shalt.err (!%p656_p5)
}
 0x134   : > { %575 = dma.vmem_to_hbm [thread:$0]  (%p783_p4), %s445_s13, 128, %s447_s14, %s429_s21  }
 0x135 PF: > { %p581_p6 = scmp.ge.s32.totalorder %s710_s23, 2  ;;  %s458_s29 = sand.u32 1, %s690_s18  }
 0x136   : > { %s459_s8 = scalar_lea.sflag [#allocation3], %s458_s29 }
 0x137   : > { %p578_p7 = pnand %p581_p6, %p790_p8 }
 0x139   : > { %p579_p9 = pneg %p578_p7 }
 0x13b   : > { %685 = dma.done.wait (%p579_p9), %s459_s8, 128  }
 0x13c   : > { %687 = vsyncadd (%p579_p9), %s459_s8, 4294967168  ;;  %s18_s23 = sadd.s32 1, %s710_s23   ;;  %s869_s18 = smov %s694_s19 }
 0x13d   : > { %p15_p10 = scmp.ge.s32.totalorder %s18_s23, 4   ;;  %s870_s19 = smov %s698_s20 }
 0x13e   : > { %s871_s20 = smov %s796_s6  ;;  %s872_s21 = smov %s706_s22 }
 0x13f   : > { %s873_s22 = smov %s875_s26  ;;  %17 = sbr.rel (!%p15_p10) target bundleno = 4 (0x4), region = 82 }
 0x144   :  { %465 = vsyncpa [#allocation3], 1 }
 0x145   :  { %467 = vsyncpa [#allocation3 + $0x1], 1 }

</bundles_post_ra>
